<compile_context>
chip_gen: v7x
topology: tpu7x:2x2x1
jax: 0.10.0
libtpu: 0.0.40
codegen_flags: <defaults>
</compile_context>

<pallas_src>
import functools

import jax
import jax.numpy as jnp
from jax import lax
from jax.experimental import pallas as pl
from jax.experimental.pallas import tpu as pltpu


def _round_up(x, m):
    return (x + m - 1) // m * m


def _focalnet_kernel(packed_ref, out_ref, *, half_h, half_w):
    """packed_ref: (8, TN) rows = [fx_ndc, fy_ndc, px_ndc, py_ndc, coef, px_i, py_i, 0].
    out_ref: (16, TN) flattened, transposed 4x4 screen-space intrinsics."""
    f32 = jnp.float32
    tn = out_ref.shape[1]

    x = packed_ref[...]                                         # (8, TN), full vregs
    row8 = lax.broadcasted_iota(jnp.int32, (8, tn), 0)

    # ---- fused elementwise pass on the packed block --------------------------
    # rows 0..3 of `vals` become fx_s, fy_s, px_s, py_s; rows 4..7 become 0.
    coef = x[4:5, :]                                            # fx ** order
    mul = jnp.where(row8 < 2, coef, jnp.ones((), f32))          # [coef,coef,1,1,1,1,1,1]
    add = jnp.where(row8 == 2, x[5:6, :],
                    jnp.where(row8 == 3, x[6:7, :], jnp.zeros((), f32)))
    scale = jnp.where((row8 == 0) | (row8 == 2), half_w,
                      jnp.where((row8 == 1) | (row8 == 3), half_h, 0.0)).astype(f32)
    off = jnp.where(row8 == 2, half_w,
                    jnp.where(row8 == 3, half_h, 0.0)).astype(f32)
    vals = (x * mul + add) * scale + off                        # (8, TN)

    # ---- get_k_from_fp: assemble flattened eye(4) in (16, N) layout ----------
    # Row index is a per-sublane constant, so these selects are trivially cheap;
    # stores are full-width unmasked lane-dense vst.
    row16 = lax.broadcasted_iota(jnp.int32, (16, tn), 0)
    k = ((row16 == 10) | (row16 == 15)).astype(f32)             # K[2,2] = K[3,3] = 1
    k = jnp.where(row16 == 0, vals[0:1, :], k)                  # K[0,0] = fx_s
    k = jnp.where(row16 == 5, vals[1:2, :], k)                  # K[1,1] = fy_s
    k = jnp.where(row16 == 2, vals[2:3, :], k)                  # K[0,2] = px_s
    k = jnp.where(row16 == 6, vals[3:4, :], k)                  # K[1,2] = py_s
    out_ref[...] = k


def focalnet_forward(i, fx_param, pp_param, init_K_ndc, H, W, *, order=2,
                     fx_only=True, block_n=32768, min_pallas_n=1024):
    """FocalNet.forward: returns (N, 4, 4) screen-space intrinsics."""
    if not fx_only:
        # TODO(synk): the non-fx_only branch multiplies by H/W, which forward()
        #             passes as None in the reference module (it would raise).
        raise NotImplementedError("Only the fx_only path of FocalNet is modeled.")

    n = i.shape[0]
    idx = i.astype(jnp.int32)
    half_h, half_w = 0.5 * float(H), 0.5 * float(W)

    # ---- per-camera gather on a tiny table, done in the wrapper --------------
    # NOTE: out-of-range indices are clipped by jnp.take (PyTorch would raise).
    fx_i = jnp.take(fx_param.astype(jnp.float32).reshape(-1), idx)            # (N,)
    pp_i = jnp.take(pp_param.astype(jnp.float32).reshape(-1, 2), idx, axis=0)  # (N,2)
    coef = fx_i * fx_i if order == 2 else fx_i   # reference: order==2 -> fx^2 else fx

    k_flat = init_K_ndc.astype(jnp.float32).reshape(n, 16)
    # Only the 4 K_ndc entries the module reads: fx=K00, fy=K11, px=K02, py=K12.
    k4 = k_flat[:, jnp.array([0, 5, 2, 6])]                                     # (N,4)

    if n < min_pallas_n:
        # Small-N fast path: fused XLA expression beats pad+launch overhead.
        fx_s = coef * k4[:, 0] * half_w
        fy_s = coef * k4[:, 1] * half_h
        px_s = (k4[:, 2] + pp_i[:, 0]) * half_w + half_w
        py_s = (k4[:, 3] + pp_i[:, 1]) * half_h + half_h
        out = jnp.broadcast_to(jnp.eye(4, dtype=jnp.float32), (n, 4, 4))
        out = out.at[:, 0, 0].set(fx_s)
        out = out.at[:, 1, 1].set(fy_s)
        out = out.at[:, 0, 2].set(px_s)
        out = out.at[:, 1, 2].set(py_s)
        return out

    # ---- packed lane-dense input: batch on lanes, 8 feature rows on sublanes --
    packed = jnp.stack(
        [k4[:, 0], k4[:, 1], k4[:, 2], k4[:, 3],
         coef, pp_i[:, 0], pp_i[:, 1], jnp.zeros((n,), jnp.float32)], axis=0)   # (8, N)

    # ---- block / padding selection --------------------------------------------
    n128 = _round_up(max(n, 1), 128)
    block_n = _round_up(max(block_n, 128), 128)
    if n128 <= 128:
        tn = 128
    else:
        # Keep >= 2 grid steps so the "parallel" axis can shard across v7x's two
        # TensorCores; cap each block at block_n (amortizes per-step overhead).
        tn = min(block_n, _round_up(-(-n128 // 2), 128))
    padded_n = _round_up(n128, tn)
    packed = jnp.pad(packed, ((0, 0), (0, padded_n - n)))

    kernel = functools.partial(_focalnet_kernel, half_h=half_h, half_w=half_w)

    out_t = pl.pallas_call(
        kernel,
        out_shape=jax.ShapeDtypeStruct((16, padded_n), jnp.float32),
        grid=(padded_n // tn,),
        in_specs=[pl.BlockSpec((8, tn), lambda j: (0, j))],      # packed features
        out_specs=pl.BlockSpec((16, tn), lambda j: (0, j)),      # K^T flattened
        compiler_params=pltpu.CompilerParams(
            dimension_semantics=("parallel",)),                  # v7x dual-TC sharding
    )(packed)

    # TODO(synk): output stays lane-dense (16, N) with unmasked full-width stores;
    # the transpose back to (N, 4, 4) is one XLA pass. Folding it into the kernel
    # would make stores 16-lane masked partials -- measure before switching, or
    # return (16, N) directly if the downstream consumer can take that layout.
    return jnp.transpose(out_t[:, :n]).reshape(n, 4, 4)


def _reference(i, fx_param, pp_param, init_K_ndc, H, W, order=2):
    """Pure-JAX reference of the same semantics (fx_only path)."""
    n = i.shape[0]
    fx_i = fx_param[i][:, 0]
    pp_i = pp_param[i]
    coef = fx_i ** 2 if order == 2 else fx_i
    init_fx = init_K_ndc[:, 0, 0]
    init_fy = init_K_ndc[:, 1, 1]
    init_px = init_K_ndc[:, 0, 2]
    init_py = init_K_ndc[:, 1, 2]
    ref = jnp.broadcast_to(jnp.eye(4, dtype=jnp.float32), (n, 4, 4))
    ref = ref.at[:, 0, 0].set(coef * init_fx * W / 2)
    ref = ref.at[:, 1, 1].set(coef * init_fy * H / 2)
    ref = ref.at[:, 0, 2].set((init_px + pp_i[:, 0]) * W / 2 + W / 2)
    ref = ref.at[:, 1, 2].set((init_py + pp_i[:, 1]) * H / 2 + H / 2)
    return ref


def _make_inputs(key, num_cams, N):
    fx_param = jnp.ones((num_cams, 1), jnp.float32) \
        + 0.1 * jnp.arange(num_cams, dtype=jnp.float32).reshape(num_cams, 1)
    pp_param = jnp.zeros((num_cams, 2), jnp.float32) \
        + 0.01 * jnp.arange(num_cams * 2, dtype=jnp.float32).reshape(num_cams, 2)
    i = jnp.arange(N, dtype=jnp.int32) % num_cams
    # TODO(synk): GTFocal source not provided; synthesize its NDC intrinsics
    # output (N, 4, 4) deterministically here instead of loading GT data.
    k1, k2 = jax.random.split(key)
    f_ndc = 1.0 + 0.1 * jax.random.normal(k1, (N, 2), jnp.float32)
    p_ndc = 0.05 * jax.random.normal(k2, (N, 2), jnp.float32)
    init_K_ndc = jnp.broadcast_to(jnp.eye(4, dtype=jnp.float32), (N, 4, 4))
    init_K_ndc = init_K_ndc.at[:, 0, 0].set(f_ndc[:, 0])
    init_K_ndc = init_K_ndc.at[:, 1, 1].set(f_ndc[:, 1])
    init_K_ndc = init_K_ndc.at[:, 0, 2].set(p_ndc[:, 0])
    init_K_ndc = init_K_ndc.at[:, 1, 2].set(p_ndc[:, 1])
    return i, fx_param, pp_param, init_K_ndc


if __name__ == "__main__":
    key = jax.random.PRNGKey(0)
    num_cams = 4
    H, W = 16.0, 16.0

    # Case 1: tiny batch (forces the Pallas path, single 128-lane block).
    k1, k2 = jax.random.split(key)
    i8, fx_p, pp_p, K8 = _make_inputs(k1, num_cams, 8)
    out8 = focalnet_forward(i8, fx_p, pp_p, K8, H, W, order=2, min_pallas_n=0)
    out8 = jax.block_until_ready(out8)
    ref8 = _reference(i8, fx_p, pp_p, K8, H, W, order=2)
    assert out8.shape == (8, 4, 4) and out8.dtype == jnp.float32
    assert jnp.allclose(out8, ref8, atol=1e-5, rtol=1e-5), (out8, ref8)

    # Case 2: N=300 exercises padding and a 2-step "parallel" grid.
    i3, fx_p3, pp_p3, K3 = _make_inputs(k2, num_cams, 300)
    out3 = focalnet_forward(i3, fx_p3, pp_p3, K3, H, W, order=2, min_pallas_n=0)
    out3 = jax.block_until_ready(out3)
    ref3 = _reference(i3, fx_p3, pp_p3, K3, H, W, order=2)
    assert out3.shape == (300, 4, 4)
    assert jnp.allclose(out3, ref3, atol=1e-5, rtol=1e-5)

    # Case 3: the small-N pure-jnp fast path (default threshold) matches too.
    out_fast = jax.block_until_ready(
        focalnet_forward(i8, fx_p, pp_p, K8, H, W, order=2))
    assert jnp.allclose(out_fast, ref8, atol=1e-5, rtol=1e-5)

    print("KERNEL_OK")
</pallas_src>

<mosaic_0001>
module attributes {stable_mosaic.version = 11 : i64} {
  func.func @_focalnet_kernel(%arg0: i32, %arg1: memref<8x128xf32, #tpu.memory_space<vmem>>, %arg2: memref<16x128xf32, #tpu.memory_space<vmem>>) attributes {dimension_semantics = [#tpu.dimension_semantics<parallel>], iteration_bounds = array<i64: 1>, scalar_prefetch = 0 : i64, scratch_operands = 0 : i64, tpu.core_type = #tpu.core_type<tc>, window_params = [{transform_indices = @transform_0, window_bounds = array<i64: 8, 128>}, {transform_indices = @transform_1, window_bounds = array<i64: 16, 128>}]} {
    %c0 = arith.constant 0 : index
    %c0_0 = arith.constant 0 : index
    %0 = vector.load %arg1[%c0, %c0_0] : memref<8x128xf32, #tpu.memory_space<vmem>>, vector<8x128xf32>
    %1 = tpu.iota {dimensions = array<i32: 0>} : vector<8x128xi32>
    %2 = vector.extract_strided_slice %0 {offsets = [4, 0], sizes = [1, 128], strides = [1, 1]} : vector<8x128xf32> to vector<1x128xf32>
    %c2_i32 = arith.constant 2 : i32
    %3 = vector.broadcast %c2_i32 : i32 to vector<8x128xi32>
    %4 = arith.cmpi slt, %1, %3 : vector<8x128xi32>
    %cst = arith.constant 1.000000e+00 : f32
    %5 = vector.shape_cast %2 : vector<1x128xf32> to vector<1x128xf32>
    %6 = vector.broadcast %5 : vector<1x128xf32> to vector<8x128xf32>
    %7 = vector.broadcast %cst : f32 to vector<8x128xf32>
    %8 = arith.select %4, %6, %7 : vector<8x128xi1>, vector<8x128xf32>
    %c2_i32_1 = arith.constant 2 : i32
    %9 = vector.broadcast %c2_i32_1 : i32 to vector<8x128xi32>
    %10 = arith.cmpi eq, %1, %9 : vector<8x128xi32>
    %11 = vector.extract_strided_slice %0 {offsets = [5, 0], sizes = [1, 128], strides = [1, 1]} : vector<8x128xf32> to vector<1x128xf32>
    %c3_i32 = arith.constant 3 : i32
    %12 = vector.broadcast %c3_i32 : i32 to vector<8x128xi32>
    %13 = arith.cmpi eq, %1, %12 : vector<8x128xi32>
    %14 = vector.extract_strided_slice %0 {offsets = [6, 0], sizes = [1, 128], strides = [1, 1]} : vector<8x128xf32> to vector<1x128xf32>
    %cst_2 = arith.constant 0.000000e+00 : f32
    %15 = vector.shape_cast %14 : vector<1x128xf32> to vector<1x128xf32>
    %16 = vector.broadcast %15 : vector<1x128xf32> to vector<8x128xf32>
    %17 = vector.broadcast %cst_2 : f32 to vector<8x128xf32>
    %18 = arith.select %13, %16, %17 : vector<8x128xi1>, vector<8x128xf32>
    %19 = vector.shape_cast %11 : vector<1x128xf32> to vector<1x128xf32>
    %20 = vector.broadcast %19 : vector<1x128xf32> to vector<8x128xf32>
    %21 = arith.select %10, %20, %18 : vector<8x128xi1>, vector<8x128xf32>
    %c0_i32 = arith.constant 0 : i32
    %22 = vector.broadcast %c0_i32 : i32 to vector<8x128xi32>
    %23 = arith.cmpi eq, %1, %22 : vector<8x128xi32>
    %c2_i32_3 = arith.constant 2 : i32
    %24 = vector.broadcast %c2_i32_3 : i32 to vector<8x128xi32>
    %25 = arith.cmpi eq, %1, %24 : vector<8x128xi32>
    %26 = arith.ori %23, %25 : vector<8x128xi1>
    %c1_i32 = arith.constant 1 : i32
    %27 = vector.broadcast %c1_i32 : i32 to vector<8x128xi32>
    %28 = arith.cmpi eq, %1, %27 : vector<8x128xi32>
    %c3_i32_4 = arith.constant 3 : i32
    %29 = vector.broadcast %c3_i32_4 : i32 to vector<8x128xi32>
    %30 = arith.cmpi eq, %1, %29 : vector<8x128xi32>
    %31 = arith.ori %28, %30 : vector<8x128xi1>
    %cst_5 = arith.constant 8.000000e+00 : f32
    %cst_6 = arith.constant 0.000000e+00 : f32
    %32 = vector.broadcast %cst_5 : f32 to vector<8x128xf32>
    %33 = vector.broadcast %cst_6 : f32 to vector<8x128xf32>
    %34 = arith.select %31, %32, %33 : vector<8x128xi1>, vector<8x128xf32>
    %cst_7 = arith.constant 8.000000e+00 : f32
    %35 = vector.broadcast %cst_7 : f32 to vector<8x128xf32>
    %36 = arith.select %26, %35, %34 : vector<8x128xi1>, vector<8x128xf32>
    %c2_i32_8 = arith.constant 2 : i32
    %37 = vector.broadcast %c2_i32_8 : i32 to vector<8x128xi32>
    %38 = arith.cmpi eq, %1, %37 : vector<8x128xi32>
    %c3_i32_9 = arith.constant 3 : i32
    %39 = vector.broadcast %c3_i32_9 : i32 to vector<8x128xi32>
    %40 = arith.cmpi eq, %1, %39 : vector<8x128xi32>
    %cst_10 = arith.constant 8.000000e+00 : f32
    %cst_11 = arith.constant 0.000000e+00 : f32
    %41 = vector.broadcast %cst_10 : f32 to vector<8x128xf32>
    %42 = vector.broadcast %cst_11 : f32 to vector<8x128xf32>
    %43 = arith.select %40, %41, %42 : vector<8x128xi1>, vector<8x128xf32>
    %cst_12 = arith.constant 8.000000e+00 : f32
    %44 = vector.broadcast %cst_12 : f32 to vector<8x128xf32>
    %45 = arith.select %38, %44, %43 : vector<8x128xi1>, vector<8x128xf32>
    %46 = arith.mulf %0, %8 : vector<8x128xf32>
    %47 = arith.addf %46, %21 : vector<8x128xf32>
    %48 = arith.mulf %47, %36 : vector<8x128xf32>
    %49 = arith.addf %48, %45 : vector<8x128xf32>
    %50 = tpu.iota {dimensions = array<i32: 0>} : vector<16x128xi32>
    %c10_i32 = arith.constant 10 : i32
    %51 = vector.broadcast %c10_i32 : i32 to vector<16x128xi32>
    %52 = arith.cmpi eq, %50, %51 : vector<16x128xi32>
    %c15_i32 = arith.constant 15 : i32
    %53 = vector.broadcast %c15_i32 : i32 to vector<16x128xi32>
    %54 = arith.cmpi eq, %50, %53 : vector<16x128xi32>
    %55 = arith.ori %52, %54 : vector<16x128xi1>
    %56 = arith.extui %55 : vector<16x128xi1> to vector<16x128xi32>
    %57 = arith.sitofp %56 : vector<16x128xi32> to vector<16x128xf32>
    %c0_i32_13 = arith.constant 0 : i32
    %58 = vector.broadcast %c0_i32_13 : i32 to vector<16x128xi32>
    %59 = arith.cmpi eq, %50, %58 : vector<16x128xi32>
    %60 = vector.extract_strided_slice %49 {offsets = [0, 0], sizes = [1, 128], strides = [1, 1]} : vector<8x128xf32> to vector<1x128xf32>
    %61 = vector.shape_cast %60 : vector<1x128xf32> to vector<1x128xf32>
    %62 = vector.broadcast %61 : vector<1x128xf32> to vector<16x128xf32>
    %63 = arith.select %59, %62, %57 : vector<16x128xi1>, vector<16x128xf32>
    %c5_i32 = arith.constant 5 : i32
    %64 = vector.broadcast %c5_i32 : i32 to vector<16x128xi32>
    %65 = arith.cmpi eq, %50, %64 : vector<16x128xi32>
    %66 = vector.extract_strided_slice %49 {offsets = [1, 0], sizes = [1, 128], strides = [1, 1]} : vector<8x128xf32> to vector<1x128xf32>
    %67 = vector.shape_cast %66 : vector<1x128xf32> to vector<1x128xf32>
    %68 = vector.broadcast %67 : vector<1x128xf32> to vector<16x128xf32>
    %69 = arith.select %65, %68, %63 : vector<16x128xi1>, vector<16x128xf32>
    %c2_i32_14 = arith.constant 2 : i32
    %70 = vector.broadcast %c2_i32_14 : i32 to vector<16x128xi32>
    %71 = arith.cmpi eq, %50, %70 : vector<16x128xi32>
    %72 = vector.extract_strided_slice %49 {offsets = [2, 0], sizes = [1, 128], strides = [1, 1]} : vector<8x128xf32> to vector<1x128xf32>
    %73 = vector.shape_cast %72 : vector<1x128xf32> to vector<1x128xf32>
    %74 = vector.broadcast %73 : vector<1x128xf32> to vector<16x128xf32>
    %75 = arith.select %71, %74, %69 : vector<16x128xi1>, vector<16x128xf32>
    %c6_i32 = arith.constant 6 : i32
    %76 = vector.broadcast %c6_i32 : i32 to vector<16x128xi32>
    %77 = arith.cmpi eq, %50, %76 : vector<16x128xi32>
    %78 = vector.extract_strided_slice %49 {offsets = [3, 0], sizes = [1, 128], strides = [1, 1]} : vector<8x128xf32> to vector<1x128xf32>
    %79 = vector.shape_cast %78 : vector<1x128xf32> to vector<1x128xf32>
    %80 = vector.broadcast %79 : vector<1x128xf32> to vector<16x128xf32>
    %81 = arith.select %77, %80, %75 : vector<16x128xi1>, vector<16x128xf32>
    %c0_15 = arith.constant 0 : index
    %c0_16 = arith.constant 0 : index
    %82 = vector.load %arg2[%c0_15, %c0_16] : memref<16x128xf32, #tpu.memory_space<vmem>>, vector<16x128xf32>
    tpu.vector_store %arg2[%c0_15, %c0_16], %81 {strides = array<i32>} : memref<16x128xf32, #tpu.memory_space<vmem>>, vector<16x128xf32>,
    return
  }
  func.func @transform_0(%arg0: i32) -> (i32, i32) {
    %c0_i32 = arith.constant 0 : i32
    %c0_i32_0 = arith.constant 0 : i32
    return %c0_i32, %arg0 : i32, i32
  }
  func.func @transform_1(%arg0: i32) -> (i32, i32) {
    %c0_i32 = arith.constant 0 : i32
    %c0_i32_0 = arith.constant 0 : i32
    return %c0_i32, %arg0 : i32, i32
  }
}

</mosaic_0001>

<bundles_post_ra>
// kernel: tpu_custom_call.1
= control target key start
LH: loop header
LB: loop body
LE: loop exit
PB: predicated region body
PF: predicated region fallthrough
CT: control target
= control target key end

     0   :  { %6 = vsyncpa [#allocation3], 0  ;;  %s222_s0 = inlined_call_operand.hbm [shape: f32[8,128], index: 0, kind: input, shape index: {}]   ;;  %s223_s1 = inlined_call_operand.hbm [shape: f32[16,128], index: 1, kind: output, shape index: {}]  }
   0x1   :  { %7 = vsyncpa [#allocation4], 0  ;;  %s168_s6 = smov [#allocation2]   ;;  %s120_s10 = scalar_lea.hbm %s222_s0, 128 }
   0x2   :  { %s14_s7 = sshll.u32 %s168_s6, 4  ;;  %p121_p0 = scmp.ne.s32.totalorder %s222_s0, %s120_s10  ;;  %s15_s7 = int_to_ptr.vmem [resolvable:$true] %s14_s7 }
   0x3   :  { %p124_p1 = scmp.lt.u32.totalorder %s120_s10, %s222_s0 }
   0x5   :  { %p126_p2 = pnand %p124_p1, %p121_p0 }
   0x7   :  { %129 = shalt.err (!%p126_p2)
}
   0x8   :  { %s130_s15 = scalar_lea.vmem %s15_s7, 128  ;;  %p135_p4 = scmp.lt.s32.totalorder %s15_s7, %s15_s7 }
   0x9   :  { %p131_p3 = scmp.ne.s32.totalorder %s15_s7, %s130_s15  ;;  %p136_p5 = scmp.lt.s32.totalorder %s130_s15, %s130_s15 }
   0xb   :  { %p137_p6 = por %p136_p5, %p135_p4 }
   0xd   :  { %p138_p7 = pnand %p137_p6, %p131_p3 }
   0xf   :  { %141 = shalt.err (!%p138_p7)
}
  0x10   :  { %17 = dma.hbm_to_vmem [thread:$0]  %s222_s0, 128, %s15_s7, [#allocation3]  }
  0x11   :  { %164 = dma.done.wait [#allocation3], 128  }
  0x12   :  { %165 = vsyncadd [#allocation3], 4294967168  ;;  %v22_v0 = vlaneseq  ;;  %v21_v5 = vld [vmem:[#allocation2] sm:$0xff]  ;;  %v169_v10 = vmov 0.0   ;;  %s170_s0 = smov [#allocation5]  }
  0x13   :  { %s102_s18 = sshll.u32 %s170_s0, 4  ;;  %s103_s18 = int_to_ptr.vmem [resolvable:$true] %s102_s18 }
  0x14   :  { %v23_v1 = vshrl.u32 %v22_v0, 7  ;;  %s142_s19 = scalar_lea.vmem %s103_s18, 256  ;;  %p147_p9 = scmp.lt.s32.totalorder %s103_s18, %s103_s18 }
  0x15   :  { %p143_p8 = scmp.ne.s32.totalorder %s103_s18, %s142_s19  ;;  %p148_p10 = scmp.lt.s32.totalorder %s142_s19, %s142_s19 }
  0x16   :  { %v27_v2 = vsub.s32 4, %v23_v1  ;;  %vm31_vm0 = vcmp.eq.s32.totalorder %v23_v1, 3  ;;  %v34_v3 = vsub.s32 6, %v23_v1  ;;  %v39_v4 = vsub.s32 5, %v23_v1 }
  0x17   :  { %vm44_vm1 = vcmp.eq.s32.totalorder %v23_v1, 1  ;;  %vm30_vm2 = vcmp.eq.s32.totalorder %v23_v1, 2  ;;  %vm42_vm3 = vcmp.eq.s32.totalorder %v23_v1, 0  ;;  %vm24_vm4 = vcmp.lt.s32.totalorder %v23_v1, 2  ;;  %p149_p11 = por %p148_p10, %p147_p9 }
  0x18   :  { %vm45_vm5 = vmor %vm44_vm1, %vm31_vm0  ;;  %v28_v6 = vrot.slane %v21_v5, %v27_v2  ;;  %v35_v7 = vrot.slane %v21_v5, %v34_v3  ;;  %v40_v8 = vrot.slane %v21_v5, %v39_v4  ;;  %v54_v12 = vadd.s32 8, %v23_v1 }
  0x19   :  { %vm198_vm6 = vmor %vm42_vm3, %vm30_vm2  ;;  %v46_v11 = vsel %vm45_vm5, 8.0, %v169_v10  ;;  %v48_v15 = vsel %vm31_vm0, 8.0, %v169_v10  ;;  %v68_v23 = vsub.s32 0, %v23_v1  ;;  %v76_v24 = vsub.s32 1, %v23_v1  ;;  %p150_p12 = pnand %p149_p11, %p143_p8 }
  0x1a   :  { %v29_v13 = vsel %vm24_vm4, %v28_v6, 1.0  ;;  %v36_v14 = vsel %vm31_vm0, %v35_v7, 0.0  ;;  %vm56_vm7 = vcmp.eq.s32.totalorder %v54_v12, 10  ;;  %vm58_vm8 = vcmp.eq.s32.totalorder %v54_v12, 15 }
  0x1b   :  { %v41_v16 = vsel %vm30_vm2, %v40_v8, %v36_v14  ;;  %v50_v17 = vmul.f32 %v29_v13, %v21_v5  ;;  %v47_v18 = vsel %vm198_vm6, 8.0, %v46_v11  ;;  %vm60_vm9 = vmor %vm56_vm7, %vm58_vm8  ;;  %v49_v21 = vsel %vm30_vm2, 8.0, %v48_v15 }
  0x1c   :  { %v114_v20 = vsel %vm60_vm9, 1.0, %v169_v10  ;;  %v83_v25 = vsub.s32 2, %v23_v1  ;;  %v91_v26 = vsub.s32 3, %v23_v1  ;;  %vm72_vm10 = vcmp.eq.s32.totalorder %v23_v1, 5 }
  0x1d   :  { %v51_v19 = vadd.f32 %v50_v17, %v41_v16  ;;  %96 = vst [vmem:[#allocation5 + $0x8] sm:$0xff] %v114_v20  ;;  %vm87_vm11 = vcmp.eq.s32.totalorder %v23_v1, 6 }
  0x1f   :  { %v52_v22 = vmul.f32 %v51_v19, %v47_v18 }
  0x21   :  { %v53_v27 = vadd.f32 %v52_v22, %v49_v21 }
  0x23   :  { %v69_v28 = vrot.slane %v53_v27, %v68_v23  ;;  %v77_v29 = vrot.slane %v53_v27, %v76_v24  ;;  %v84_v30 = vrot.slane %v53_v27, %v83_v25  ;;  %v92_v31 = vrot.slane %v53_v27, %v91_v26 }
  0x25   :  { %v70_v32 = vsel %vm42_vm3, %v69_v28, 0.0 }
  0x26   :  { %v78_v33 = vsel %vm72_vm10, %v77_v29, %v70_v32 }
  0x27   :  { %v85_v34 = vsel %vm30_vm2, %v84_v30, %v78_v33 }
  0x28   :  { %v93_v35 = vsel %vm87_vm11, %v92_v31, %v85_v34 }
  0x29   :  { %95 = vst [vmem:[#allocation5] sm:$0xff] %v93_v35 }
  0x2a   :  { %153 = shalt.err (!%p150_p12)
}
  0x2b   :  { %s154_s22 = scalar_lea.hbm %s223_s1, 256 }
  0x2c   :  { %p155_p13 = scmp.ne.s32.totalorder %s223_s1, %s154_s22  ;;  %p158_p0 = scmp.lt.u32.totalorder %s154_s22, %s223_s1 }
  0x2e   :  { %p160_p1 = pnand %p158_p0, %p155_p13 }
  0x30   :  { %163 = shalt.err (!%p160_p1)
}
  0x31   :  { %s171_s27 = smov 128   ;;  %s172_s28 = smov 8  }
  0x32   :  { %108 = dma.vmem_to_hbm [thread:$0]  %s103_s18, 256, %s223_s1, [#allocation4], %s171_s27, %s171_s27, %s172_s28  }
  0x33   :  { %166 = dma.done.wait [#allocation4], 256  }
  0x34   :  { %167 = vsyncadd [#allocation4], 4294967040 }
  0x35   :  { %112 = vsyncpa [#allocation3], 1 }
  0x36   :  { %113 = vsyncpa [#allocation4], 1 }

</bundles_post_ra>
